<compile_context>
chip_gen: v5e
topology: v5e:2x2
jax: 0.10.0
libtpu: 0.0.40
codegen_flags: <defaults>
</compile_context>

<pallas_src>
import functools

import jax
import jax.numpy as jnp
from jax import lax
from jax.experimental import pallas as pl
from jax.experimental.pallas import tpu as pltpu

CIN, COUT, K, PAD = 3, 3, 5, 2
CLAMP_MIN = -0.5
CLAMP_MAX = 0.2


@functools.cache
def _roll_conventions():
    """One-time probe of pltpu.roll direction on lane (axis=1) and sublane (axis=0).

    Returns (lane_like_jnp, sublane_like_jnp): True if pltpu.roll(x, s, axis)
    matches jnp.roll(x, s, axis) (out[i] = x[(i - s) % n]) on that axis.
    """
    x = jnp.arange(8 * 128, dtype=jnp.int32).reshape(8, 128)

    def probe(x_ref, lane_ref, sub_ref):
        lane_ref[...] = pltpu.roll(x_ref[...], 3, axis=1)
        sub_ref[...] = pltpu.roll(x_ref[...], 3, axis=0)

    lane, sub = pl.pallas_call(
        probe,
        out_shape=(jax.ShapeDtypeStruct((8, 128), jnp.int32),
                   jax.ShapeDtypeStruct((8, 128), jnp.int32)))(x)

    def direction(got, axis):
        if bool(jnp.array_equal(got, jnp.roll(x, 3, axis=axis))):
            return True
        if bool(jnp.array_equal(got, jnp.roll(x, -3, axis=axis))):
            return False
        raise RuntimeError("unexpected pltpu.roll semantics")

    return direction(lane, 1), direction(sub, 0)


def _make_kernel(lane_like_jnp: bool, sub_like_jnp: bool):
    def conv_clamp_kernel(w_ref, b_ref, x_ref, o_ref):
        # w_ref: SMEM (COUT*CIN*K*K,) flattened OIHW weights
        # b_ref: SMEM (COUT,)
        # x_ref: VMEM (1, CIN, WIN, Wp)  -- WIN = TH + halo rows (multiple of 8)
        # o_ref: VMEM (1, COUT, TH, Wp)
        TH, Wp = o_ref.shape[2], o_ref.shape[3]
        WIN = x_ref.shape[2]

        # Per-kw edge masks (valid <=> 0 <= w + d < Wp), hoisted once.
        col = lax.broadcasted_iota(jnp.int32, (TH, Wp), dimension=1)
        masks = {}
        for kw in range(K):
            d = kw - PAD
            if d != 0:
                masks[kw] = (col >= -d) & (col < Wp - d)

        # co innermost with 3 live accumulators -> every shifted tap is built
        # once and reused across all output channels.
        accs = [jnp.full((TH, Wp), b_ref[co], dtype=jnp.float32)
                for co in range(COUT)]

        for ci in range(CIN):
            chan = x_ref[0, ci, :, :]                 # (WIN, Wp), loaded once per ci
            for kh in range(K):
                # rows[r, :] = chan[r + kh, :]; sublane roll + aligned slice
                # instead of a sublane-misaligned row window (offsets 1..4).
                if kh == 0:
                    rows = chan[:TH, :]
                else:
                    s = (-kh) % WIN if sub_like_jnp else kh % WIN
                    rows = pltpu.roll(chan, s, axis=0)[:TH, :]
                for kw in range(K):
                    d = kw - PAD
                    if d == 0:
                        tap = rows
                    else:
                        # tap[:, w] = rows[:, w + d], zero outside the image.
                        s = (-d) % Wp if lane_like_jnp else d % Wp
                        rolled = pltpu.roll(rows, s, axis=1)
                        tap = jnp.where(masks[kw], rolled, 0.0)
                    for co in range(COUT):
                        widx = ((co * CIN + ci) * K + kh) * K + kw
                        accs[co] = accs[co] + w_ref[widx] * tap

        for co in range(COUT):
            acc = jnp.maximum(accs[co], CLAMP_MIN)    # torch.clamp_min
            acc = jnp.minimum(acc, CLAMP_MAX)         # torch.clamp_max
            o_ref[0, co, :, :] = acc

    return conv_clamp_kernel


def conv2d_clamp(x, weight, bias, *, tile_h=16):
    """x: (N, CIN, H, W); weight: (COUT, CIN, K, K); bias: (COUT,)."""
    N, C, H, W = x.shape
    assert C == CIN

    x = x.astype(jnp.float32)
    w_flat = weight.reshape(-1).astype(jnp.float32)
    b = bias.astype(jnp.float32)

    # ---- Tiling choices --------------------------------------------------
    # Lane-dense width (right zero-pad doubles as conv zero padding; padded
    # columns are sliced off the output).
    Wp = ((W + 127) // 128) * 128
    # H tile: multiple of 8, kept small enough that each (TH, Wp) f32 slab is
    # <= 8 vregs (no accumulator spills) and per-step VMEM blocks stay tiny on
    # every chip generation.
    TH = max(8, (int(tile_h) // 8) * 8)
    TH = min(TH, max(8, ((H + 7) // 8) * 8))
    while TH > 8 and TH * Wp * 4 > (32 << 10):
        TH -= 8
    Hp = ((H + TH - 1) // TH) * TH
    T = Hp // TH
    WIN = ((TH + 2 * PAD + 7) // 8) * 8              # halo'd window, mult. of 8

    # ---- Host-side prep: pad, then materialize the overlapping H-windows so
    # every grid step consumes a plain, fully aligned block. ----------------
    pad_top = PAD
    pad_bot = (T - 1) * TH + WIN - PAD - H           # >= PAD
    x_p = jnp.pad(x, ((0, 0), (0, 0), (pad_top, pad_bot), (0, Wp - W)))
    x_t = jnp.stack([x_p[:, :, t * TH: t * TH + WIN, :] for t in range(T)],
                    axis=1)                           # (N, T, CIN, WIN, Wp)
    x_t = x_t.reshape(N * T, CIN, WIN, Wp)

    in_block = CIN * WIN * Wp * 4
    out_block = COUT * TH * Wp * 4
    # double-buffered in+out blocks + generous headroom, capped under every
    # chip's scoped-VMEM ceiling.
    vmem_limit = int(min(32 << 20, max(8 << 20, 4 * (in_block + out_block))))

    lane_like_jnp, sub_like_jnp = _roll_conventions()
    kernel = _make_kernel(lane_like_jnp, sub_like_jnp)

    cost = pl.CostEstimate(
        flops=int(2 * N * COUT * CIN * K * K * Hp * Wp),
        transcendentals=0,
        bytes_accessed=int(x_t.size * 4 + N * COUT * Hp * Wp * 4
                           + w_flat.size * 4 + b.size * 4),
    )

    out = pl.pallas_call(
        kernel,
        out_shape=jax.ShapeDtypeStruct((N, COUT, Hp, Wp), jnp.float32),
        grid=(N, T),
        in_specs=[
            pl.BlockSpec(memory_space=pltpu.MemorySpace.SMEM),     # weights
            pl.BlockSpec(memory_space=pltpu.MemorySpace.SMEM),     # bias
            pl.BlockSpec((1, CIN, WIN, Wp),
                         lambda n, t: (n * T + t, 0, 0, 0)),       # halo'd window
        ],
        out_specs=pl.BlockSpec((1, COUT, TH, Wp),
                               lambda n, t: (n, 0, t, 0)),
        compiler_params=pltpu.CompilerParams(
            dimension_semantics=("parallel", "parallel"),
            vmem_limit_bytes=vmem_limit),
        cost_estimate=cost,
    )(w_flat, b, x_t)

    return out[:, :, :H, :W]


def reference(x, weight, bias):
    y = lax.conv_general_dilated(
        x, weight, window_strides=(1, 1),
        padding=[(PAD, PAD), (PAD, PAD)],
        dimension_numbers=("NCHW", "OIHW", "NCHW"))
    y = y + bias.reshape(1, COUT, 1, 1)
    y = jnp.maximum(y, CLAMP_MIN)
    y = jnp.minimum(y, CLAMP_MAX)
    return y


if __name__ == "__main__":
    key = jax.random.PRNGKey(0)
    kx, kw_, kb = jax.random.split(key, 3)

    # Shapes consistent with the module: Conv2d(3 -> 3, k=5, pad=2) on 32x256.
    N, H, W = 2, 32, 256
    x = jax.random.normal(kx, (N, CIN, H, W), dtype=jnp.float32)

    # Deterministic PyTorch-style uniform(-1/sqrt(fan_in), 1/sqrt(fan_in)) init.
    fan_in = CIN * K * K
    bound = 1.0 / (fan_in ** 0.5)
    weight = jax.random.uniform(kw_, (COUT, CIN, K, K), jnp.float32,
                                minval=-bound, maxval=bound)
    bias = jax.random.uniform(kb, (COUT,), jnp.float32,
                              minval=-bound, maxval=bound)

    out = jax.block_until_ready(conv2d_clamp(x, weight, bias))
    ref = jax.block_until_ready(reference(x, weight, bias))

    assert out.shape == (N, COUT, H, W)
    assert jnp.allclose(out, ref, atol=1e-4, rtol=1e-4), "mismatch vs reference"

    print("KERNEL_OK")
</pallas_src>

<mosaic_0001>
module attributes {stable_mosaic.version = 11 : i64} {
  func.func @probe(%arg0: memref<8x128xi32, #tpu.memory_space<vmem>>, %arg1: memref<8x128xi32, #tpu.memory_space<vmem>>, %arg2: memref<8x128xi32, #tpu.memory_space<vmem>>) attributes {dimension_semantics = [], scalar_prefetch = 0 : i64, scratch_operands = 0 : i64, tpu.core_type = #tpu.core_type<tc>} {
    %c0 = arith.constant 0 : index
    %c0_0 = arith.constant 0 : index
    %0 = vector.load %arg0[%c0, %c0_0] : memref<8x128xi32, #tpu.memory_space<vmem>>, vector<8x128xi32>
    %c3_i32 = arith.constant 3 : i32
    %1 = tpu.dynamic_rotate %0 by %c3_i32 dim 1 : vector<8x128xi32>, i32 -> vector<8x128xi32>
    %c0_1 = arith.constant 0 : index
    %c0_2 = arith.constant 0 : index
    %2 = vector.load %arg1[%c0_1, %c0_2] : memref<8x128xi32, #tpu.memory_space<vmem>>, vector<8x128xi32>
    tpu.vector_store %arg1[%c0_1, %c0_2], %1 {strides = array<i32>} : memref<8x128xi32, #tpu.memory_space<vmem>>, vector<8x128xi32>,
    %c0_3 = arith.constant 0 : index
    %c0_4 = arith.constant 0 : index
    %3 = vector.load %arg0[%c0_3, %c0_4] : memref<8x128xi32, #tpu.memory_space<vmem>>, vector<8x128xi32>
    %c3_i32_5 = arith.constant 3 : i32
    %4 = tpu.dynamic_rotate %3 by %c3_i32_5 dim 0 : vector<8x128xi32>, i32 -> vector<8x128xi32>
    %c0_6 = arith.constant 0 : index
    %c0_7 = arith.constant 0 : index
    %5 = vector.load %arg2[%c0_6, %c0_7] : memref<8x128xi32, #tpu.memory_space<vmem>>, vector<8x128xi32>
    tpu.vector_store %arg2[%c0_6, %c0_7], %4 {strides = array<i32>} : memref<8x128xi32, #tpu.memory_space<vmem>>, vector<8x128xi32>,
    return
  }
}

</mosaic_0001>

<bundles_post_ra>
// kernel: tpu_custom_call.1
= control target key start
LH: loop header
LB: loop body
LE: loop exit
PB: predicated region body
PF: predicated region fallthrough
CT: control target
= control target key end

     0   :  { %8 = vsyncpa [#allocation3], 0  ;;  %s176_s0 = inlined_call_operand.hbm [shape: s32[8,128], index: 0, kind: input, shape index: {}]   ;;  %s177_s1 = inlined_call_operand.hbm [shape: s32[8,128], index: 1, kind: output, shape index: {0}]   ;;  %s178_s2 = inlined_call_operand.hbm [shape: s32[8,128], index: 2, kind: output, shape index: {1}]  }
   0x1   :  { %9 = vsyncpa [#allocation4], 0 }
   0x2   :  { %10 = vsyncpa [#allocation7], 0  ;;  %s16_s11 = sshll.u32 %s176_s0, 4  ;;  %s148_s12 = smov [#allocation2]   ;;  %s17_s11 = int_to_ptr.hbm [resolvable:$true] %s16_s11 }
   0x3   :  { %s18_s13 = sshll.u32 %s148_s12, 4  ;;  %s19_s13 = int_to_ptr.vmem [resolvable:$true] %s18_s13 }
   0x4   :  { %21 = dma.hbm_to_vmem [thread:$0]  %s17_s11, 128, %s19_s13, [#allocation3]  }
   0x5   :  { %142 = dma.done.wait [#allocation3], 128  }
   0x6   :  { %143 = vsyncadd [#allocation3], 4294967168  ;;  %v26_v0 = vld [vmem:[#allocation2] sm:$0xff]  ;;  %s149_s14 = smov 3   ;;  %s150_s15 = smov [#allocation6]  }
   0x7   :  { %27 = vrot.lane.b32.xlu0 %v26_v0, %s149_s14  ;;  %s49_s16 = sshll.u32 %s150_s15, 4  ;;  %s51_s19 = sshll.u32 %s178_s2, 4  ;;  %v31_v1 = vrot.slane %v26_v0, 5  ;;  %s50_s16 = int_to_ptr.vmem [resolvable:$true] %s49_s16  ;;  %s52_s19 = int_to_ptr.hbm [resolvable:$true] %s51_s19 }
   0x8   :  { %s151_s0 = smov [#allocation5]   ;;  %s40_s23 = sshll.u32 %s177_s1, 4  ;;  %s41_s23 = int_to_ptr.hbm [resolvable:$true] %s40_s23 }
   0x9   :  { %32 = vst [vmem:[#allocation6] sm:$0xff] %v31_v1  ;;  %s38_s20 = sshll.u32 %s151_s0, 4  ;;  %s39_s20 = int_to_ptr.vmem [resolvable:$true] %s38_s20 }
   0xa   :  { %54 = dma.vmem_to_hbm [thread:$0]  %s50_s16, 128, %s52_s19, [#allocation7]  }
  0x79   :  { %v28_v2 = vpop.permute.xlu0 %27 }
  0x7a   :  { %29 = vst [vmem:[#allocation5] sm:$0xff] %v28_v2 }
  0x7b   :  { %43 = dma.vmem_to_hbm [thread:$0]  %s39_s20, 128, %s41_s23, [#allocation4]  }
  0x7c   :  { %144 = dma.done.wait [#allocation4], 128  }
  0x7d   :  { %145 = vsyncadd [#allocation4], 4294967168 }
  0x7e   :  { %146 = dma.done.wait [#allocation7], 128  }
  0x7f   :  { %147 = vsyncadd [#allocation7], 4294967168 }
  0x80   :  { %63 = vsyncpa [#allocation3], 1 }
  0x81   :  { %64 = vsyncpa [#allocation4], 1 }
  0x82   :  { %65 = vsyncpa [#allocation7], 1 }

</bundles_post_ra>
